<compile_context>
chip_gen: v5e
topology: v5e:2x2
jax: 0.10.0
libtpu: 0.0.40
codegen_flags: <defaults>
</compile_context>

<pallas_src>
import functools
import math

import numpy as np
import jax
import jax.numpy as jnp
from jax.experimental import pallas as pl
from jax.experimental.pallas import tpu as pltpu


# ----------------------------- host-side operator construction -----------------------------

def _gaussian_1d(ksize: int, sigma: float) -> np.ndarray:
    t = np.arange(ksize, dtype=np.float64)
    mean = (ksize - 1) / 2.0
    g = np.exp(-0.5 * ((t - mean) / sigma) ** 2)
    return g / g.sum()


def _conv_same_matrix(n: int, g: np.ndarray) -> np.ndarray:
    """M such that M @ v == 1-D cross-correlation of v with g, zero 'same' padding."""
    k = g.shape[0]
    pad = k // 2
    M = np.zeros((n, n), dtype=np.float64)
    for i in range(n):
        for t in range(k):
            j = i + t - pad
            if 0 <= j < n:
                M[i, j] += g[t]
    return M


def _bilinear_resize_matrix(out_size: int, in_size: int) -> np.ndarray:
    """Matrix reproducing F.interpolate(mode='bilinear', align_corners=False) along one axis."""
    M = np.zeros((out_size, in_size), dtype=np.float64)
    scale = in_size / out_size
    for i in range(out_size):
        src = max(scale * (i + 0.5) - 0.5, 0.0)
        i0 = min(int(np.floor(src)), in_size - 1)
        i1 = min(i0 + 1, in_size - 1)
        lam = src - i0
        M[i, i0] += 1.0 - lam
        M[i, i1] += lam
    return M


def init_params(in_c, gauss_ker_size, scales, H, W, key):
    """Deterministic parameter construction mirroring LaPlacianMs.__init__ (inference)."""
    S = len(scales)
    HW = H * W
    ah_list, aw_list, rt_list = [], [], []
    for s in scales:
        g = _gaussian_1d(gauss_ker_size, float(s))            # GaussianSmoothing(in_c, 3, s)
        Hd, Wd = int(math.floor(H / s)), int(math.floor(W / s))
        Ah = _bilinear_resize_matrix(H, Hd) @ _bilinear_resize_matrix(Hd, H) @ _conv_same_matrix(H, g)
        Aw = _bilinear_resize_matrix(W, Wd) @ _bilinear_resize_matrix(Wd, W) @ _conv_same_matrix(W, g)
        ah_list.append(Ah)
        aw_list.append(Aw)
        # vec_row(Ah @ X @ Aw^T) = (Ah kron Aw) @ vec_row(X); residual operator folded on host
        # in float64:  resid_row = x_row @ (I - K)^T
        K = np.kron(Ah, Aw)
        rt_list.append((np.eye(HW) - K).T)

    ahs = np.stack(ah_list).astype(np.float32)                 # (S, H, H)   -- reference only
    aws = np.stack(aw_list).astype(np.float32)                 # (S, W, W)   -- reference only
    rts = np.stack(rt_list)                                    # (S, HW, HW) float64

    # Conv2d(in_c*S, in_c, 1, bias=False) with kaiming_normal_ (fan_in, gain sqrt(2)).
    O = in_c
    fan_in = in_c * S
    std = math.sqrt(2.0 / fan_in)
    w1 = np.asarray(jax.random.normal(key, (O, in_c * S), dtype=jnp.float32)) * std

    # BatchNorm2d(in_c) inference: gamma=1, beta=0, running_mean=0, running_var=1, eps=1e-5.
    eps = 1e-5
    bn_scale = np.full((O,), 1.0 / math.sqrt(1.0 + eps), dtype=np.float32)
    bn_bias = np.zeros((O,), dtype=np.float32)

    # Fold BN scale into the conv weight; reorder to per-scale (S, O, C) slices.
    wf = (w1 * bn_scale[:, None]).reshape(O, S, in_c).transpose(1, 0, 2).astype(np.float32)

    return dict(
        rts=jnp.asarray(rts.astype(np.float32), dtype=jnp.bfloat16),   # (S,HW,HW) MXU operand
        wf=jnp.asarray(wf, dtype=jnp.float32),                         # (S,O,C) f32 (cast later)
        bias=jnp.asarray(bn_bias, dtype=jnp.float32),                  # (O,) f32
        ahs=jnp.asarray(ahs), aws=jnp.asarray(aws),                    # f32 reference operators
    )


# ------------------------------------- Pallas kernel ---------------------------------------

def _laplacian_ms_kernel(x_ref, rt_ref, w_ref, b_ref, o_ref, *, num_scales):
    # x_ref  : VMEM (BT*C, HW)        bf16  batch tile, spatially flattened (lane-dense)
    # rt_ref : VMEM (S, HW, HW)       bf16  resident residual operators (I - K_s)^T
    # w_ref  : VMEM (S, BT*O, BT*C)   bf16  resident block-diag folded 1x1-conv/BN weights
    # b_ref  : VMEM (BT*O, 1)         f32   folded BN bias (tiled over the batch tile)
    # o_ref  : VMEM (BT*O, HW)        f32   sublane/lane-dense output tile
    x = x_ref[...]                                                     # (BT*C, HW) bf16
    y = jnp.zeros(o_ref.shape, jnp.float32)                            # f32 accumulator (vregs)
    for s in range(num_scales):                                        # static unroll over scales
        # Smoothing + down/up + residual for all channels & batch rows: one MXU matmul.
        resid = jnp.dot(x, rt_ref[s], preferred_element_type=jnp.float32)      # (BT*C, HW) f32
        # Folded 1x1-conv slice for this scale (block-diag over the batch tile): MXU matmul.
        y = y + jnp.dot(w_ref[s], resid.astype(jnp.bfloat16),
                        preferred_element_type=jnp.float32)                    # (BT*O, HW) f32
    o_ref[...] = jnp.maximum(y + b_ref[...], 0.0).astype(o_ref.dtype)


def laplacian_ms_forward(x, rts, wf, bias, *, batch_tile=None):
    N, C, H, W = x.shape
    S, HW, HW2 = rts.shape
    assert HW == H * W and HW2 == HW
    O = wf.shape[1]

    # Pick a batch tile: fill the MXU M dimension (up to 256 rows) while dividing N evenly.
    if batch_tile is None:
        batch_tile = max(1, min(N, 256 // max(C, 1)))
        while N % batch_tile:
            batch_tile -= 1
    BT = batch_tile
    assert N % BT == 0
    assert (BT * C) % 8 == 0 or BT == N, "row tile must be sublane-aligned or cover the batch"

    # Lane-dense trailing dim (H*W); x shipped in bf16 (residual operator already folds I - K).
    x_flat = x.reshape(N * C, HW).astype(jnp.bfloat16)

    # Block-diagonal per-scale conv weights kron(I_BT, W_s) and tiled bias for this tile size.
    eye = jnp.eye(BT, dtype=jnp.float32)
    w_blk = jax.vmap(lambda w: jnp.kron(eye, w))(wf).astype(jnp.bfloat16)      # (S, BT*O, BT*C)
    b_blk = jnp.tile(bias.reshape(O, 1), (BT, 1)).astype(jnp.float32)          # (BT*O, 1)

    kernel = functools.partial(_laplacian_ms_kernel, num_scales=S)

    out_flat = pl.pallas_call(
        kernel,
        out_shape=jax.ShapeDtypeStruct((N * O, HW), jnp.float32),
        grid_spec=pltpu.PrefetchScalarGridSpec(
            num_scalar_prefetch=0,
            grid=(N // BT,),                              # batch tiles only; scales in-kernel
            in_specs=[
                pl.BlockSpec((BT * C, HW), lambda i: (i, 0)),
                pl.BlockSpec((S, HW, HW), lambda i: (0, 0, 0)),        # resident (DMA'd once)
                pl.BlockSpec((S, BT * O, BT * C), lambda i: (0, 0, 0)),  # resident
                pl.BlockSpec((BT * O, 1), lambda i: (0, 0)),             # resident
            ],
            out_specs=pl.BlockSpec((BT * O, HW), lambda i: (i, 0)),
        ),
        compiler_params=pltpu.CompilerParams(
            dimension_semantics=("parallel",),
        ),
    )(x_flat, rts, w_blk, b_blk)
    return out_flat.reshape(N, O, H, W)


# --------------------------------- pure-JAX f32 reference ----------------------------------

def reference_forward(x, ahs, aws, wf32, bias):
    S = ahs.shape[0]
    acc = None
    for s in range(S):
        sm = jnp.einsum('ij,bcjk,lk->bcil', ahs[s], x, aws[s])   # A_h @ X @ A_w^T per channel
        part = jnp.einsum('oc,bchw->bohw', wf32[s], x - sm)
        acc = part if acc is None else acc + part
    y = acc + bias.reshape(1, -1, 1, 1)
    return jnp.maximum(y, 0.0)


# ----------------------------------------- driver ------------------------------------------

if __name__ == "__main__":
    N, in_c, H, W = 2, 4, 16, 16
    scales = [2, 4]
    gauss_ker_size = 3

    key = jax.random.PRNGKey(0)
    kx, kw = jax.random.split(key)
    x = jax.random.normal(kx, (N, in_c, H, W), dtype=jnp.float32)

    p = init_params(in_c, gauss_ker_size, scales, H, W, kw)

    out = laplacian_ms_forward(x, p["rts"], p["wf"], p["bias"])
    out = jax.block_until_ready(out)

    assert out.shape == (N, in_c, H, W), out.shape
    assert bool(jnp.all(jnp.isfinite(out)))
    assert bool(jnp.all(out >= 0.0))                   # ReLU output

    ref = reference_forward(x, p["ahs"], p["aws"], p["wf"], p["bias"])
    max_err = float(jnp.max(jnp.abs(out - ref)))
    assert max_err < 0.2, f"mismatch vs f32 reference: {max_err}"   # bf16-MXU tolerance

    print("KERNEL_OK")
</pallas_src>

<mosaic_0001>
module attributes {stable_mosaic.version = 11 : i64} {
  func.func @_laplacian_ms_kernel(%arg0: i32, %arg1: memref<8x256xbf16, #tpu.memory_space<vmem>>, %arg2: memref<2x256x256xbf16, #tpu.memory_space<vmem>>, %arg3: memref<2x8x8xbf16, #tpu.memory_space<vmem>>, %arg4: memref<8x1xf32, #tpu.memory_space<vmem>>, %arg5: memref<8x256xf32, #tpu.memory_space<vmem>>) attributes {dimension_semantics = [#tpu.dimension_semantics<parallel>], iteration_bounds = array<i64: 1>, scalar_prefetch = 0 : i64, scratch_operands = 0 : i64, tpu.core_type = #tpu.core_type<tc>, window_params = [{transform_indices = @transform_0, window_bounds = array<i64: 8, 256>}, {pipeline_mode = #tpu.pipeline_mode<synchronous>, transform_indices = @transform_1, window_bounds = array<i64: 2, 256, 256>}, {pipeline_mode = #tpu.pipeline_mode<synchronous>, transform_indices = @transform_2, window_bounds = array<i64: 2, 8, 8>}, {pipeline_mode = #tpu.pipeline_mode<synchronous>, transform_indices = @transform_3, window_bounds = array<i64: 8, 1>}, {transform_indices = @transform_4, window_bounds = array<i64: 8, 256>}]} {
    %c0 = arith.constant 0 : index
    %c0_0 = arith.constant 0 : index
    %0 = vector.load %arg1[%c0, %c0_0] : memref<8x256xbf16, #tpu.memory_space<vmem>>, vector<8x256xbf16>
    %cst = arith.constant 0.000000e+00 : f32
    %1 = vector.broadcast %cst : f32 to vector<8x256xf32>
    %c0_1 = arith.constant 0 : index
    %c0_2 = arith.constant 0 : index
    %c0_3 = arith.constant 0 : index
    %2 = vector.load %arg2[%c0_1, %c0_2, %c0_3] : memref<2x256x256xbf16, #tpu.memory_space<vmem>>, vector<1x256x256xbf16>
    %3 = vector.shape_cast %2 : vector<1x256x256xbf16> to vector<256x256xbf16>
    %cst_4 = arith.constant dense<0.000000e+00> : vector<8x256xf32>
    %4 = tpu.matmul %0, %3, %cst_4 {dimension_numbers = #tpu.dot_dimension_numbers<[1], [0], [0], [1], [0, 0, 1, 1], [], []>} : vector<8x256xbf16>, vector<256x256xbf16>, vector<8x256xf32> -> vector<8x256xf32>
    %c0_5 = arith.constant 0 : index
    %c0_6 = arith.constant 0 : index
    %c0_7 = arith.constant 0 : index
    %5 = vector.load %arg3[%c0_5, %c0_6, %c0_7] : memref<2x8x8xbf16, #tpu.memory_space<vmem>>, vector<1x8x8xbf16>
    %6 = vector.shape_cast %5 : vector<1x8x8xbf16> to vector<8x8xbf16>
    %7 = arith.truncf %4 : vector<8x256xf32> to vector<8x256xbf16>
    %cst_8 = arith.constant dense<0.000000e+00> : vector<8x256xf32>
    %8 = tpu.matmul %6, %7, %cst_8 {dimension_numbers = #tpu.dot_dimension_numbers<[1], [0], [0], [1], [0, 0, 1, 1], [], []>} : vector<8x8xbf16>, vector<8x256xbf16>, vector<8x256xf32> -> vector<8x256xf32>
    %9 = arith.addf %1, %8 : vector<8x256xf32>
    %c1 = arith.constant 1 : index
    %c0_9 = arith.constant 0 : index
    %c0_10 = arith.constant 0 : index
    %10 = vector.load %arg2[%c1, %c0_9, %c0_10] : memref<2x256x256xbf16, #tpu.memory_space<vmem>>, vector<1x256x256xbf16>
    %11 = vector.shape_cast %10 : vector<1x256x256xbf16> to vector<256x256xbf16>
    %cst_11 = arith.constant dense<0.000000e+00> : vector<8x256xf32>
    %12 = tpu.matmul %0, %11, %cst_11 {dimension_numbers = #tpu.dot_dimension_numbers<[1], [0], [0], [1], [0, 0, 1, 1], [], []>} : vector<8x256xbf16>, vector<256x256xbf16>, vector<8x256xf32> -> vector<8x256xf32>
    %c1_12 = arith.constant 1 : index
    %c0_13 = arith.constant 0 : index
    %c0_14 = arith.constant 0 : index
    %13 = vector.load %arg3[%c1_12, %c0_13, %c0_14] : memref<2x8x8xbf16, #tpu.memory_space<vmem>>, vector<1x8x8xbf16>
    %14 = vector.shape_cast %13 : vector<1x8x8xbf16> to vector<8x8xbf16>
    %15 = arith.truncf %12 : vector<8x256xf32> to vector<8x256xbf16>
    %cst_15 = arith.constant dense<0.000000e+00> : vector<8x256xf32>
    %16 = tpu.matmul %14, %15, %cst_15 {dimension_numbers = #tpu.dot_dimension_numbers<[1], [0], [0], [1], [0, 0, 1, 1], [], []>} : vector<8x8xbf16>, vector<8x256xbf16>, vector<8x256xf32> -> vector<8x256xf32>
    %17 = arith.addf %9, %16 : vector<8x256xf32>
    %c0_16 = arith.constant 0 : index
    %c0_17 = arith.constant 0 : index
    %18 = vector.load %arg4[%c0_16, %c0_17] : memref<8x1xf32, #tpu.memory_space<vmem>>, vector<8x1xf32>
    %19 = vector.broadcast %18 : vector<8x1xf32> to vector<8x256xf32>
    %20 = arith.addf %17, %19 : vector<8x256xf32>
    %cst_18 = arith.constant 0.000000e+00 : f32
    %21 = vector.broadcast %cst_18 : f32 to vector<8x256xf32>
    %22 = arith.maximumf %20, %21 : vector<8x256xf32>
    %c0_19 = arith.constant 0 : index
    %c0_20 = arith.constant 0 : index
    %23 = vector.load %arg5[%c0_19, %c0_20] : memref<8x256xf32, #tpu.memory_space<vmem>>, vector<8x256xf32>
    tpu.vector_store %arg5[%c0_19, %c0_20], %22 {strides = array<i32>} : memref<8x256xf32, #tpu.memory_space<vmem>>, vector<8x256xf32>,
    return
  }
  func.func @transform_0(%arg0: i32) -> (i32, i32) {
    %c0_i32 = arith.constant 0 : i32
    %c0_i32_0 = arith.constant 0 : i32
    return %arg0, %c0_i32 : i32, i32
  }
  func.func @transform_1(%arg0: i32) -> (i32, i32, i32) {
    %c0_i32 = arith.constant 0 : i32
    %c0_i32_0 = arith.constant 0 : i32
    %c0_i32_1 = arith.constant 0 : i32
    %c0_i32_2 = arith.constant 0 : i32
    return %c0_i32, %c0_i32_0, %c0_i32_1 : i32, i32, i32
  }
  func.func @transform_2(%arg0: i32) -> (i32, i32, i32) {
    %c0_i32 = arith.constant 0 : i32
    %c0_i32_0 = arith.constant 0 : i32
    %c0_i32_1 = arith.constant 0 : i32
    %c0_i32_2 = arith.constant 0 : i32
    return %c0_i32, %c0_i32_0, %c0_i32_1 : i32, i32, i32
  }
  func.func @transform_3(%arg0: i32) -> (i32, i32) {
    %c0_i32 = arith.constant 0 : i32
    %c0_i32_0 = arith.constant 0 : i32
    %c0_i32_1 = arith.constant 0 : i32
    return %c0_i32, %c0_i32_0 : i32, i32
  }
  func.func @transform_4(%arg0: i32) -> (i32, i32) {
    %c0_i32 = arith.constant 0 : i32
    %c0_i32_0 = arith.constant 0 : i32
    return %arg0, %c0_i32 : i32, i32
  }
}

</mosaic_0001>

<bundles_post_ra>
// kernel: tpu_custom_call.1
= control target key start
LH: loop header
LB: loop body
LE: loop exit
PB: predicated region body
PF: predicated region fallthrough
CT: control target
= control target key end

     0   :  { %9 = vsyncpa [#allocation3], 0  ;;  %s1136_s0 = inlined_call_operand.vmem [shape: bf16[8,256], index: 0, kind: input, shape index: {}]   ;;  %s1137_s1 = inlined_call_operand.hbm [shape: bf16[2,256,256], index: 1, kind: input, shape index: {}]   ;;  %s1138_s2 = inlined_call_operand.hbm [shape: bf16[2,8,8], index: 2, kind: input, shape index: {}]   ;;  %s1139_s3 = inlined_call_operand.vmem [shape: f32[8,1], index: 3, kind: input, shape index: {}]   ;;  %s1140_s4 = inlined_call_operand.hbm [shape: f32[8,256], index: 4, kind: output, shape index: {}]  }
   0x1   :  { %10 = vsyncpa [#allocation6], 0 }
   0x2   :  { %11 = vsyncpa [#allocation4], 0  ;;  %s18_s17 = sshll.u32 %s1137_s1, 4  ;;  %s1068_s18 = smov [#allocation2]   ;;  %s19_s17 = int_to_ptr.hbm [resolvable:$true] %s18_s17 }
   0x3   :  { %s20_s19 = sshll.u32 %s1068_s18, 4  ;;  %s31_s22 = sshll.u32 %s1138_s2, 4  ;;  %s21_s19 = int_to_ptr.vmem [resolvable:$true] %s20_s19  ;;  %s32_s22 = int_to_ptr.hbm [resolvable:$true] %s31_s22 }
   0x4   :  { %s1069_s23 = smov 128   ;;  %s1070_s24 = smov 8  }
   0x5   :  { %26 = dma.hbm_to_vmem [thread:$0]  %s19_s17, 8192, %s21_s19, [#allocation3], %s1069_s23, %s1069_s23, %s1070_s24  }
   0x6   :  { %s1071_s25 = smov [#allocation5]   ;;  %s1072_s27 = smov 64  }
   0x7   :  { %s33_s26 = sshll.u32 %s1071_s25, 4  ;;  %s1073_s28 = smov 4   ;;  %s34_s26 = int_to_ptr.vmem [resolvable:$true] %s33_s26 }
   0x8   :  { %39 = dma.hbm_to_vmem [thread:$0]  %s32_s22, 128, %s34_s26, [#allocation6], %s1072_s27, %s1072_s27, %s1073_s28  }
   0x9   :  { %1062 = dma.done.wait [#allocation3], 8192  }
   0xa   :  { %1063 = vsyncadd [#allocation3], 4294959104 }
   0xb   :  { %1064 = dma.done.wait [#allocation6], 128  }
   0xc   :  { %1065 = vsyncadd [#allocation6], 4294967168  ;;  %v715_v0 = vld [vmem:[#allocation2 + $0x70] sm:$0xf]  ;;  %v932_v1 = vld [vmem:[#allocation2 + $0x74] sm:$0xf0] }
   0xd   :  { %v779_v2 = vld [vmem:[#allocation2 + $0xf0] sm:$0xf]  ;;  %v716_v3 = vor.u32 %v932_v1, %v715_v0  ;;  %v948_v4 = vld [vmem:[#allocation2 + $0xf4] sm:$0xf0]  ;;  %v931_v5 = vld [vmem:[#allocation2 + $0x74] sm:$0xf] }
   0xe   :  { %v717_v6 = vld [vmem:[#allocation2 + $0x78] sm:$0xf0]  ;;  %v780_v7 = vor.u32 %v948_v4, %v779_v2  ;;  %v947_v9 = vld [vmem:[#allocation2 + $0xf4] sm:$0xf]  ;;  %v707_v11 = vld [vmem:[#allocation2 + $0x60] sm:$0xf] }
   0xf   :  { %v720_v8 = vor.u32 %v931_v5, %v717_v6  ;;  %v781_v10 = vld [vmem:[#allocation2 + $0xf8] sm:$0xf0]  ;;  %251 = vmatpush.bf16.msra.mxu0 %v716_v3  ;;  %v930_v13 = vld [vmem:[#allocation2 + $0x64] sm:$0xf0]  ;;  %v771_v14 = vld [vmem:[#allocation2 + $0xe0] sm:$0xf] }
  0x10   :  { %v784_v12 = vor.u32 %v947_v9, %v781_v10  ;;  %v946_v15 = vld [vmem:[#allocation2 + $0xe4] sm:$0xf0]  ;;  %264 = vmatpush.bf16.msra.mxu1 %v780_v7  ;;  %v708_v16 = vor.u32 %v930_v13, %v707_v11  ;;  %v929_v18 = vld [vmem:[#allocation2 + $0x64] sm:$0xf]  ;;  %v709_v19 = vld [vmem:[#allocation2 + $0x68] sm:$0xf0] }
  0x11   :  { %277 = vmatpush.bf16.msra.mxu2 %v720_v8  ;;  %v772_v17 = vor.u32 %v946_v15, %v771_v14  ;;  %v945_v20 = vld [vmem:[#allocation2 + $0xe4] sm:$0xf]  ;;  %v712_v21 = vor.u32 %v929_v18, %v709_v19  ;;  %v773_v22 = vld [vmem:[#allocation2 + $0xe8] sm:$0xf0]  ;;  %v699_v23 = vld [vmem:[#allocation2 + $0x50] sm:$0xf] }
  0x12   :  { %290 = vmatpush.bf16.msra.mxu3 %v784_v12  ;;  %v928_v24 = vld [vmem:[#allocation2 + $0x54] sm:$0xf0]  ;;  %v776_v25 = vor.u32 %v945_v20, %v773_v22  ;;  %v763_v26 = vld [vmem:[#allocation2 + $0xd0] sm:$0xf]  ;;  %v927_v28 = vld [vmem:[#allocation2 + $0x54] sm:$0xf] }
  0x13   :  { %v944_v27 = vld [vmem:[#allocation2 + $0xd4] sm:$0xf0]  ;;  %252 = vmatpush.bf16.msra.mxu0 %v708_v16  ;;  %v700_v29 = vor.u32 %v928_v24, %v699_v23  ;;  %v701_v30 = vld [vmem:[#allocation2 + $0x58] sm:$0xf0]  ;;  %v943_v31 = vld [vmem:[#allocation2 + $0xd4] sm:$0xf] }
  0x14   :  { %v765_v32 = vld [vmem:[#allocation2 + $0xd8] sm:$0xf0]  ;;  %265 = vmatpush.bf16.msra.mxu1 %v772_v17  ;;  %v764_v33 = vor.u32 %v944_v27, %v763_v26  ;;  %v704_v34 = vor.u32 %v927_v28, %v701_v30  ;;  %v691_v35 = vld [vmem:[#allocation2 + $0x40] sm:$0xf]  ;;  %v926_v36 = vld [vmem:[#allocation2 + $0x44] sm:$0xf0] }
  0x15   :  { %278 = vmatpush.bf16.msra.mxu2 %v712_v21  ;;  %v755_v37 = vld [vmem:[#allocation2 + $0xc0] sm:$0xf]  ;;  %v768_v38 = vor.u32 %v943_v31, %v765_v32  ;;  %v942_v39 = vld [vmem:[#allocation2 + $0xc4] sm:$0xf0]  ;;  %v925_v40 = vld [vmem:[#allocation2 + $0x44] sm:$0xf]  ;;  %v692_v44 = vor.u32 %v926_v36, %v691_v35 }
  0x16   :  { %291 = vmatpush.bf16.msra.mxu3 %v776_v25  ;;  %v693_v41 = vld [vmem:[#allocation2 + $0x48] sm:$0xf0]  ;;  %v941_v42 = vld [vmem:[#allocation2 + $0xc4] sm:$0xf]  ;;  %v756_v45 = vor.u32 %v942_v39, %v755_v37  ;;  %v683_v47 = vld [vmem:[#allocation2 + $0x30] sm:$0xf] }
  0x17   :  { %v757_v43 = vld [vmem:[#allocation2 + $0xc8] sm:$0xf0]  ;;  %253 = vmatpush.bf16.msra.mxu0 %v700_v29  ;;  %v696_v46 = vor.u32 %v925_v40, %v693_v41  ;;  %v924_v48 = vld [vmem:[#allocation2 + $0x34] sm:$0xf0]  ;;  %v747_v49 = vld [vmem:[#allocation2 + $0xb0] sm:$0xf] }
  0x18   :  { %266 = vmatpush.bf16.msra.mxu1 %v764_v33  ;;  %v760_v50 = vor.u32 %v941_v42, %v757_v43  ;;  %v940_v51 = vld [vmem:[#allocation2 + $0xb4] sm:$0xf0]  ;;  %v923_v52 = vld [vmem:[#allocation2 + $0x34] sm:$0xf]  ;;  %v685_v53 = vld [vmem:[#allocation2 + $0x38] sm:$0xf0]  ;;  %v684_v56 = vor.u32 %v924_v48, %v683_v47 }
  0x19   :  { %279 = vmatpush.bf16.msra.mxu2 %v704_v34  ;;  %v939_v54 = vld [vmem:[#allocation2 + $0xb4] sm:$0xf]  ;;  %v749_v55 = vld [vmem:[#allocation2 + $0xb8] sm:$0xf0]  ;;  %v748_v57 = vor.u32 %v940_v51, %v747_v49  ;;  %v688_v58 = vor.u32 %v923_v52, %v685_v53  ;;  %v675_v59 = vld [vmem:[#allocation2 + $0x20] sm:$0xf] }
  0x1a   :  { %292 = vmatpush.bf16.msra.mxu3 %v768_v38  ;;  %v922_v60 = vld [vmem:[#allocation2 + $0x24] sm:$0xf0]  ;;  %v739_v61 = vld [vmem:[#allocation2 + $0xa0] sm:$0xf]  ;;  %v752_v62 = vor.u32 %v939_v54, %v749_v55  ;;  %v921_v0 = vld [vmem:[#allocation2 + $0x24] sm:$0xf] }
  0x1b   :  { %254 = vmatpush.bf16.msra.mxu0 %v692_v44  ;;  %v938_v63 = vld [vmem:[#allocation2 + $0xa4] sm:$0xf0]  ;;  %v677_v1 = vld [vmem:[#allocation2 + $0x28] sm:$0xf0]  ;;  %v937_v2 = vld [vmem:[#allocation2 + $0xa4] sm:$0xf]  ;;  %v676_v4 = vor.u32 %v922_v60, %v675_v59 }
  0x1c   :  { %267 = vmatpush.bf16.msra.mxu1 %v756_v45  ;;  %v741_v3 = vld [vmem:[#allocation2 + $0xa8] sm:$0xf0]  ;;  %v740_v5 = vor.u32 %v938_v63, %v739_v61  ;;  %v680_v6 = vor.u32 %v921_v0, %v677_v1  ;;  %v667_v7 = vld [vmem:[#allocation2 + $0x10] sm:$0xf]  ;;  %v920_v8 = vld [vmem:[#allocation2 + $0x14] sm:$0xf0] }
  0x1d   :  { %280 = vmatpush.bf16.msra.mxu2 %v696_v46  ;;  %v731_v9 = vld [vmem:[#allocation2 + $0x90] sm:$0xf]  ;;  %v744_v10 = vor.u32 %v937_v2, %v741_v3  ;;  %v936_v11 = vld [vmem:[#allocation2 + $0x94] sm:$0xf0]  ;;  %v919_v12 = vld [vmem:[#allocation2 + $0x14] sm:$0xf]  ;;  %v668_v16 = vor.u32 %v920_v8, %v667_v7 }
  0x1e   :  { %293 = vmatpush.bf16.msra.mxu3 %v760_v50  ;;  %v669_v13 = vld [vmem:[#allocation2 + $0x18] sm:$0xf0]  ;;  %v935_v14 = vld [vmem:[#allocation2 + $0x94] sm:$0xf]  ;;  %v659_v17 = vld [vmem:[#allocation2] sm:$0xf]  ;;  %v732_v20 = vor.u32 %v936_v11, %v731_v9 }
  0x1f   :  { %255 = vmatpush.bf16.msra.mxu0 %v684_v56  ;;  %v733_v15 = vld [vmem:[#allocation2 + $0x98] sm:$0xf0]  ;;  %v918_v18 = vld [vmem:[#allocation2 + $0x4] sm:$0xf0]  ;;  %v723_v19 = vld [vmem:[#allocation2 + $0x80] sm:$0xf]  ;;  %v672_v21 = vor.u32 %v919_v12, %v669_v13 }
  0x20   :  { %268 = vmatpush.bf16.msra.mxu1 %v748_v57  ;;  %v934_v22 = vld [vmem:[#allocation2 + $0x84] sm:$0xf0]  ;;  %v917_v23 = vld [vmem:[#allocation2 + $0x4] sm:$0xf]  ;;  %v661_v24 = vld [vmem:[#allocation2 + $0x8] sm:$0xf0]  ;;  %v736_v25 = vor.u32 %v935_v14, %v733_v15  ;;  %v660_v32 = vor.u32 %v918_v18, %v659_v17 }
  0x21   :  { %281 = vmatpush.bf16.msra.mxu2 %v688_v58  ;;  %v933_v26 = vld [vmem:[#allocation2 + $0x84] sm:$0xf]  ;;  %v725_v27 = vld [vmem:[#allocation2 + $0x88] sm:$0xf0]  ;;  %v843_v28 = vld [vmem:[#allocation2 + $0x170] sm:$0xf]  ;;  %v724_v37 = vor.u32 %v934_v22, %v723_v19  ;;  %v664_v38 = vor.u32 %v917_v23, %v661_v24 }
  0x22   :  { %294 = vmatpush.bf16.msra.mxu3 %v752_v62  ;;  %v964_v29 = vld [vmem:[#allocation2 + $0x174] sm:$0xf0]  ;;  %v907_v30 = vld [vmem:[#allocation2 + $0x1f0] sm:$0xf]  ;;  %v51_v31 = vld [vmem:[%s1136_s0] sm:$0xff]  ;;  %v728_v42 = vor.u32 %v933_v26, %v725_v27  ;;  %vm559_vm0 = vcmask 1043456  }
  0x23   :  { %256 = vmatpush.bf16.msra.mxu0 %v676_v4  ;;  %v980_v33 = vld [vmem:[#allocation2 + $0x1f4] sm:$0xf0]  ;;  %v963_v34 = vld [vmem:[#allocation2 + $0x174] sm:$0xf]  ;;  %v845_v35 = vld [vmem:[#allocation2 + $0x178] sm:$0xf0]  ;;  %v85_v36 = vunpack.c.l.b16 %v51_v31  ;;  %v86_v41 = vunpack.c.h.b16 %v51_v31  ;;  %v844_v43 = vor.u32 %v964_v29, %v843_v28 }
  0x24   :  { %269 = vmatpush.bf16.msra.mxu1 %v740_v5  ;;  %v979_v39 = vld [vmem:[#allocation2 + $0x1f4] sm:$0xf]  ;;  %v909_v40 = vld [vmem:[#allocation2 + $0x1f8] sm:$0xf0]  ;;  %v908_v44 = vor.u32 %v980_v33, %v907_v30  ;;  %v848_v45 = vor.u32 %v963_v34, %v845_v35  ;;  %v835_v46 = vld [vmem:[#allocation2 + $0x160] sm:$0xf] }
  0x25   :  { %282 = vmatpush.bf16.msra.mxu2 %v680_v6  ;;  %v962_v47 = vld [vmem:[#allocation2 + $0x164] sm:$0xf0]  ;;  %v899_v48 = vld [vmem:[#allocation2 + $0x1e0] sm:$0xf]  ;;  %v912_v49 = vor.u32 %v979_v39, %v909_v40  ;;  %v961_v51 = vld [vmem:[#allocation2 + $0x164] sm:$0xf]  ;;  %v1110_v53 = vpack.c.b16 %v85_v36, %v85_v36  ;;  %v1112_v56 = vpack.c.b16 %v86_v41, %v86_v41 }
  0x26   :  { %295 = vmatpush.bf16.msra.mxu3 %v744_v10  ;;  %v978_v50 = vld [vmem:[#allocation2 + $0x1e4] sm:$0xf0]  ;;  %v837_v52 = vld [vmem:[#allocation2 + $0x168] sm:$0xf0]  ;;  %v977_v54 = vld [vmem:[#allocation2 + $0x1e4] sm:$0xf]  ;;  %v836_v57 = vor.u32 %v962_v47, %v835_v46 }
  0x27   :  { %257 = vmatpush.bf16.msra.mxu0 %v668_v16  ;;  %v901_v55 = vld [vmem:[#allocation2 + $0x1e8] sm:$0xf0]  ;;  %v900_v58 = vor.u32 %v978_v50, %v899_v48  ;;  %v840_v59 = vor.u32 %v961_v51, %v837_v52  ;;  %v827_v60 = vld [vmem:[#allocation2 + $0x150] sm:$0xf]  ;;  %v960_v61 = vld [vmem:[#allocation2 + $0x154] sm:$0xf0] }
  0x28   :  { %270 = vmatpush.bf16.msra.mxu1 %v732_v20  ;;  %v891_v62 = vld [vmem:[#allocation2 + $0x1d0] sm:$0xf]  ;;  %v904_v63 = vor.u32 %v977_v54, %v901_v55  ;;  %v976_v0 = vld [vmem:[#allocation2 + $0x1d4] sm:$0xf0]  ;;  %v959_v1 = vld [vmem:[#allocation2 + $0x154] sm:$0xf]  ;;  %v828_v5 = vor.u32 %v960_v61, %v827_v60 }
  0x29   :  { %283 = vmatpush.bf16.msra.mxu2 %v672_v21  ;;  %v829_v2 = vld [vmem:[#allocation2 + $0x158] sm:$0xf0]  ;;  %v975_v3 = vld [vmem:[#allocation2 + $0x1d4] sm:$0xf]  ;;  %v892_v6 = vor.u32 %v976_v0, %v891_v62  ;;  %v819_v8 = vld [vmem:[#allocation2 + $0x140] sm:$0xf] }
  0x2a   :  { %296 = vmatpush.bf16.msra.mxu3 %v736_v25  ;;  %v893_v4 = vld [vmem:[#allocation2 + $0x1d8] sm:$0xf0]  ;;  %v832_v7 = vor.u32 %v959_v1, %v829_v2  ;;  %v958_v9 = vld [vmem:[#allocation2 + $0x144] sm:$0xf0]  ;;  %v883_v10 = vld [vmem:[#allocation2 + $0x1c0] sm:$0xf] }
  0x2b   :  { %258 = vmatpush.bf16.msra.mxu0 %v660_v32  ;;  %v896_v11 = vor.u32 %v975_v3, %v893_v4  ;;  %v974_v12 = vld [vmem:[#allocation2 + $0x1c4] sm:$0xf0]  ;;  %v957_v13 = vld [vmem:[#allocation2 + $0x144] sm:$0xf]  ;;  %v821_v14 = vld [vmem:[#allocation2 + $0x148] sm:$0xf0]  ;;  %v820_v17 = vor.u32 %v958_v9, %v819_v8 }
  0x2c   :  { %271 = vmatpush.bf16.msra.mxu1 %v724_v37  ;;  %v973_v15 = vld [vmem:[#allocation2 + $0x1c4] sm:$0xf]  ;;  %v885_v16 = vld [vmem:[#allocation2 + $0x1c8] sm:$0xf0]  ;;  %v884_v18 = vor.u32 %v974_v12, %v883_v10  ;;  %v824_v19 = vor.u32 %v957_v13, %v821_v14  ;;  %v811_v20 = vld [vmem:[#allocation2 + $0x130] sm:$0xf] }
  0x2d   :  { %284 = vmatpush.bf16.msra.mxu2 %v664_v38  ;;  %v956_v21 = vld [vmem:[#allocation2 + $0x134] sm:$0xf0]  ;;  %v875_v22 = vld [vmem:[#allocation2 + $0x1b0] sm:$0xf]  ;;  %v888_v23 = vor.u32 %v973_v15, %v885_v16  ;;  %v955_v25 = vld [vmem:[#allocation2 + $0x134] sm:$0xf] }
  0x2e   :  { %297 = vmatpush.bf16.msra.mxu3 %v728_v42  ;;  %259 = vmatmul.bf16.vlgmr.msra.gmra.mxu0 %v1110_v53  ;;  %v972_v24 = vld [vmem:[#allocation2 + $0x1b4] sm:$0xf0]  ;;  %v813_v26 = vld [vmem:[#allocation2 + $0x138] sm:$0xf0]  ;;  %v971_v27 = vld [vmem:[#allocation2 + $0x1b4] sm:$0xf]  ;;  %v812_v29 = vor.u32 %v956_v21, %v811_v20 }
  0x2f   :  { %499 = vmatpush.bf16.msrb.mxu0 %v844_v43  ;;  %272 = vmatmul.bf16.vlgmr.msra.gmra.mxu1 %v1112_v56  ;;  %v877_v28 = vld [vmem:[#allocation2 + $0x1b8] sm:$0xf0]  ;;  %v876_v30 = vor.u32 %v972_v24, %v875_v22  ;;  %v816_v31 = vor.u32 %v955_v25, %v813_v26  ;;  %v803_v32 = vld [vmem:[#allocation2 + $0x120] sm:$0xf]  ;;  %v954_v33 = vld [vmem:[#allocation2 + $0x124] sm:$0xf0] }
  0x30   :  { %512 = vmatpush.bf16.msrb.mxu1 %v908_v44  ;;  %285 = vmatmul.bf16.vlgmr.msra.gmra.mxu2 %v1110_v53  ;;  %v867_v34 = vld [vmem:[#allocation2 + $0x1a0] sm:$0xf]  ;;  %v880_v35 = vor.u32 %v971_v27, %v877_v28  ;;  %v970_v36 = vld [vmem:[#allocation2 + $0x1a4] sm:$0xf0]  ;;  %v953_v37 = vld [vmem:[#allocation2 + $0x124] sm:$0xf]  ;;  %v804_v41 = vor.u32 %v954_v33, %v803_v32 }
  0x31   :  { %525 = vmatpush.bf16.msrb.mxu2 %v848_v45  ;;  %298 = vmatmul.bf16.vlgmr.msra.gmra.mxu3 %v1112_v56  ;;  %v805_v38 = vld [vmem:[#allocation2 + $0x128] sm:$0xf0]  ;;  %v969_v39 = vld [vmem:[#allocation2 + $0x1a4] sm:$0xf]  ;;  %v868_v42 = vor.u32 %v970_v36, %v867_v34  ;;  %v795_v44 = vld [vmem:[#allocation2 + $0x110] sm:$0xf] }
  0x32   :  { %538 = vmatpush.bf16.msrb.mxu3 %v912_v49  ;;  %v869_v40 = vld [vmem:[#allocation2 + $0x1a8] sm:$0xf0]  ;;  %v808_v43 = vor.u32 %v953_v37, %v805_v38  ;;  %v952_v45 = vld [vmem:[#allocation2 + $0x114] sm:$0xf0]  ;;  %v859_v46 = vld [vmem:[#allocation2 + $0x190] sm:$0xf] }
  0x33   :  { %500 = vmatpush.bf16.msrb.mxu0 %v836_v57  ;;  %v872_v47 = vor.u32 %v969_v39, %v869_v40  ;;  %v968_v48 = vld [vmem:[#allocation2 + $0x194] sm:$0xf0]  ;;  %v951_v49 = vld [vmem:[#allocation2 + $0x114] sm:$0xf]  ;;  %v797_v50 = vld [vmem:[#allocation2 + $0x118] sm:$0xf0]  ;;  %v796_v54 = vor.u32 %v952_v45, %v795_v44 }
  0x34   :  { %513 = vmatpush.bf16.msrb.mxu1 %v900_v58  ;;  %v967_v51 = vld [vmem:[#allocation2 + $0x194] sm:$0xf]  ;;  %v861_v52 = vld [vmem:[#allocation2 + $0x198] sm:$0xf0]  ;;  %v860_v55 = vor.u32 %v968_v48, %v859_v46  ;;  %v800_v57 = vor.u32 %v951_v49, %v797_v50  ;;  %v787_v58 = vld [vmem:[#allocation2 + $0x100] sm:$0xf] }
  0x35   :  { %526 = vmatpush.bf16.msrb.mxu2 %v840_v59  ;;  %v950_v59 = vld [vmem:[#allocation2 + $0x104] sm:$0xf0]  ;;  %v851_v60 = vld [vmem:[#allocation2 + $0x180] sm:$0xf]  ;;  %v864_v61 = vor.u32 %v967_v51, %v861_v52  ;;  %v789_v0 = vld [vmem:[#allocation2 + $0x108] sm:$0xf0] }
  0x36   :  { %539 = vmatpush.bf16.msrb.mxu3 %v904_v63  ;;  %v966_v62 = vld [vmem:[#allocation2 + $0x184] sm:$0xf0]  ;;  %v949_v63 = vld [vmem:[#allocation2 + $0x104] sm:$0xf]  ;;  %v853_v2 = vld [vmem:[#allocation2 + $0x188] sm:$0xf0]  ;;  %v788_v3 = vor.u32 %v950_v59, %v787_v58 }
  0x37   :  { %501 = vmatpush.bf16.msrb.mxu0 %v828_v5  ;;  %v965_v1 = vld [vmem:[#allocation2 + $0x184] sm:$0xf]  ;;  %v852_v4 = vor.u32 %v966_v62, %v851_v60  ;;  %v792_v5 = vor.u32 %v949_v63, %v789_v0  ;;  %v303_v15 = vld [vmem:[#allocation5] sm:$0xf]  ;;  %vm555_vm1 = vcmask 64512   ;;  %v1074_v21 = vmov 0  }
  0x38   :  { %514 = vmatpush.bf16.msrb.mxu1 %v892_v6  ;;  %v856_v6 = vor.u32 %v965_v1, %v853_v2  ;;  %989 = vset.pattern.permute.xlu0 %v1074_v21  ;;  %v552_v28 = vld [vmem:[#allocation5 + $0x4] sm:$0xf]  ;;  %s646_s7 = sshll.u32 %s1140_s4, 4  ;;  %s647_s7 = int_to_ptr.hbm [resolvable:$true] %s646_s7 }
  0x39   :  { %527 = vmatpush.bf16.msrb.mxu2 %v832_v7 }
  0x3a   :  { %540 = vmatpush.bf16.msrb.mxu3 %v896_v11 }
  0x3b   :  { %502 = vmatpush.bf16.msrb.mxu0 %v820_v17 }
  0x3c   :  { %515 = vmatpush.bf16.msrb.mxu1 %v884_v18 }
  0x3d   :  { %528 = vmatpush.bf16.msrb.mxu2 %v824_v19  ;;  %v627_v19 = vld [vmem:[%s1139_s3] sm:$0xff]  ;;  %s1075_s3 = smov [#allocation7]  }
  0x3e   :  { %541 = vmatpush.bf16.msrb.mxu3 %v888_v23  ;;  %630 = vperm.xlu0 %989, %v627_v19   ;;  %s644_s30 = sshll.u32 %s1075_s3, 4  ;;  %s645_s30 = int_to_ptr.vmem [resolvable:$true] %s644_s30 }
  0x3f   :  { %503 = vmatpush.bf16.msrb.mxu0 %v812_v29 }
  0x40   :  { %516 = vmatpush.bf16.msrb.mxu1 %v876_v30 }
  0x41   :  { %529 = vmatpush.bf16.msrb.mxu2 %v816_v31 }
  0x42   :  { %542 = vmatpush.bf16.msrb.mxu3 %v880_v35 }
  0x43   :  { %504 = vmatpush.bf16.msrb.mxu0 %v804_v41 }
  0x44   :  { %517 = vmatpush.bf16.msrb.mxu1 %v868_v42 }
  0x45   :  { %530 = vmatpush.bf16.msrb.mxu2 %v808_v43 }
  0x46   :  { %543 = vmatpush.bf16.msrb.mxu3 %v872_v47 }
  0x47   :  { %505 = vmatpush.bf16.msrb.mxu0 %v796_v54 }
  0x48   :  { %518 = vmatpush.bf16.msrb.mxu1 %v860_v55 }
  0x49   :  { %531 = vmatpush.bf16.msrb.mxu2 %v800_v57 }
  0x4a   :  { %544 = vmatpush.bf16.msrb.mxu3 %v864_v61 }
  0x4b   :  { %506 = vmatpush.bf16.msrb.mxu0 %v788_v3 }
  0x4c   :  { %519 = vmatpush.bf16.msrb.mxu1 %v852_v4 }
  0x4d   :  { %532 = vmatpush.bf16.msrb.mxu2 %v792_v5 }
  0x4e   :  { %545 = vmatpush.bf16.msrb.mxu3 %v856_v6  ;;  %507 = vmatmul.bf16.vlgmr.msrb.gmra.mxu0 %v1110_v53 }
  0x4f   :  { %520 = vmatmul.bf16.vlgmr.msrb.gmra.mxu1 %v1112_v56 }
  0x50   :  { %533 = vmatmul.bf16.vlgmr.msrb.gmra.mxu2 %v1110_v53 }
  0x51   :  { %546 = vmatmul.bf16.vlgmr.msrb.gmra.mxu3 %v1112_v56 }
  0xab   :  { %v260_v7 = vpop.f32.mrf.mxu0 }
  0xac   :  { %v273_v8 = vpop.f32.mrf.mxu1 }
  0xad   :  { %v274_v9 = vadd.f32 %v273_v8, %v260_v7 }
  0xaf   :  { %v304_v10 = vpack.c.bf16 %v274_v9, %v274_v9 }
  0xb0   :  { %v631_v42 = vpop.permute.xlu0 %630 }
  0xb1   :  { %v596_v12 = vsel %vm559_vm0, %v304_v10, 0 }
  0xb2   :  { %608 = vmatpush.bf16.msra.mxu2 %v596_v12 }
  0xb3   :  { %v286_v11 = vpop.f32.mrf.mxu2  ;;  %v262_v16 = vpop.f32.mrf.mxu0 }
  0xb4   :  { %v299_v13 = vpop.f32.mrf.mxu3  ;;  %v275_v18 = vpop.f32.mrf.mxu1 }
  0xb5   :  { %v300_v14 = vadd.f32 %v299_v13, %v286_v11  ;;  %915 = vmatmul.msk.bf16.vlgmr.msra.gmra.mxu2 %vm555_vm1, %v303_v15 }
  0xb7   :  { %v305_v17 = vpack.c.bf16 %v300_v14, %v300_v14 }
  0xb9   :  { %v599_v53 = vsel %vm559_vm0, %v305_v17, 0 }
  0xba   :  { %621 = vmatpush.bf16.msra.mxu3 %v599_v53 }
  0xbb   :  { %v288_v56 = vpop.f32.mrf.mxu2 }
  0xbc   :  { %v301_v20 = vpop.f32.mrf.mxu3 }
  0xbd   :  { %916 = vmatmul.msk.bf16.vlgmr.msra.gmra.mxu3 %vm555_vm1, %v303_v15 }
  0xcb   :  { %v508_v22 = vpop.f32.mrf.mxu0 }
  0xcc   :  { %v521_v23 = vpop.f32.mrf.mxu1 }
  0xcd   :  { %v522_v24 = vadd.f32 %v521_v23, %v508_v22 }
  0xcf   :  { %v553_v25 = vpack.c.bf16 %v522_v24, %v522_v24 }
  0xd1   :  { %v561_v26 = vsel %vm559_vm0, %v553_v25, 0 }
  0xd2   :  { %573 = vmatpush.bf16.msra.mxu0 %v561_v26 }
  0xd3   :  { %v534_v27 = vpop.f32.mrf.mxu2  ;;  %v510_v30 = vpop.f32.mrf.mxu0 }
  0xd4   :  { %v547_v29 = vpop.f32.mrf.mxu3  ;;  %v523_v32 = vpop.f32.mrf.mxu1 }
  0xd5   :  { %v548_v31 = vadd.f32 %v547_v29, %v534_v27  ;;  %913 = vmatmul.msk.bf16.vlgmr.msra.gmra.mxu0 %vm555_vm1, %v552_v28 }
  0xd7   :  { %v554_v33 = vpack.c.bf16 %v548_v31, %v548_v31 }
  0xd9   :  { %v564_v34 = vsel %vm559_vm0, %v554_v33, 0 }
  0xda   :  { %586 = vmatpush.bf16.msra.mxu1 %v564_v34 }
  0xdb   :  { %v536_v35 = vpop.f32.mrf.mxu2 }
  0xdc   :  { %v549_v36 = vpop.f32.mrf.mxu3 }
  0xdd   :  { %914 = vmatmul.msk.bf16.vlgmr.msra.gmra.mxu1 %vm555_vm1, %v552_v28 }
 0x138   :  { %v610_v37 = vpop.f32.mrf.mxu2 }
 0x140   :  { %v623_v38 = vpop.f32.mrf.mxu3  ;;  %v612_v39 = vpop.f32.mrf.mxu2 }
 0x148   :  { %v625_v40 = vpop.f32.mrf.mxu3 }
 0x152   :  { %v575_v41 = vpop.f32.mrf.mxu0 }
 0x153   :  { %v611_v43 = vadd.f32 %v610_v37, %v575_v41 }
 0x155   :  { %v633_v44 = vadd.f32 %v631_v42, %v611_v43 }
 0x157   :  { %v635_v45 = vmax.f32 %v633_v44, 0.0 }
 0x159   :  { %637 = vst [vmem:[#allocation7] sm:$0xff] %v635_v45 }
 0x15a   :  { %v588_v46 = vpop.f32.mrf.mxu1  ;;  %v577_v48 = vpop.f32.mrf.mxu0 }
 0x15b   :  { %v624_v47 = vadd.f32 %v623_v38, %v588_v46 }
 0x15d   :  { %v634_v49 = vadd.f32 %v631_v42, %v624_v47 }
 0x15f   :  { %v636_v50 = vmax.f32 %v634_v49, 0.0 }
 0x161   :  { %638 = vst [vmem:[#allocation7 + $0x8] sm:$0xff] %v636_v50 }
 0x162   :  { %v590_v51 = vpop.f32.mrf.mxu1  ;;  %649 = dma.vmem_to_hbm [thread:$0]  %s645_s30, 256, %s647_s7, [#allocation4]  }
 0x163   :  { %1066 = dma.done.wait [#allocation4], 256  }
 0x164   :  { %1067 = vsyncadd [#allocation4], 4294967040 }
 0x165   :  { %654 = vsyncpa [#allocation3], 1 }
 0x166   :  { %655 = vsyncpa [#allocation6], 1 }
 0x167   :  { %656 = vsyncpa [#allocation4], 1 }

</bundles_post_ra>
